<compile_context>
chip_gen: v6e
topology: v6e:2x2x1
jax: 0.10.0
libtpu: 0.0.40
codegen_flags: <defaults>
</compile_context>

<pallas_src>
import functools

import jax
import jax.numpy as jnp
from jax.experimental import pallas as pl
from jax.experimental.pallas import tpu as pltpu


def _round_up(x, m):
    return (x + m - 1) // m * m


def _pick_tile_hw(hw, k_pad, max_tile_hw):
    # Cap the lane-direction tile so the live (K_pad, T) f32 temporaries
    # (cross, d, exps, probs, enc, ...) stay around <= 10 MiB of VMEM.
    budget = 10 * 1024 * 1024
    t_cap = max(128, (budget // (6 * k_pad * 4)) // 128 * 128)
    tile = min(hw, max_tile_hw, t_cap)
    if tile >= hw:
        return hw                      # single full-extent tile (always legal)
    return max(128, tile // 128 * 128)  # partial tiles must be lane-aligned


def _vq_kernel(scal_ref, z_ref, cb2_ref, esq_ref, cbt_ref,
               zq_ref, psum_ref, msum_ref,
               *, tile_hw, hw_valid, needs_mask, flg_soft):
    # scal_ref: SMEM (1, 2) -> [precision, precision / temperature]
    # z_ref:    (1, D, T)   encoder tile, channels in sublanes
    # cb2_ref:  (K, D)      2 * codebook, matmul dtype (bf16)
    # esq_ref:  (K, 1)      hoisted ||e_k||^2 (padded rows hold 1e30)
    # cbt_ref:  (D, K)      codebook transposed (f32 det path / bf16 soft path)
    prec = scal_ref[0, 0]
    scale = scal_ref[0, 1]                                   # prec / temperature

    z = z_ref[0].astype(jnp.float32)                         # (D, T)

    # 2 * e_k . z_n on the MXU (bf16 operands, f32 accumulation).
    cross2 = jax.lax.dot_general(
        cb2_ref[...], z.astype(cb2_ref.dtype),
        (((1,), (0,)), ((), ())),
        preferred_element_type=jnp.float32)                  # (K, T)

    # Shifted squared distance d'_{k,n} = ||e_k||^2 - 2 e_k.z_n
    # (softmax / argmin over k are invariant to the per-position ||z_n||^2).
    d = esq_ref[...] - cross2                                # (K, T)
    kp = d.shape[0]

    dmin = jnp.min(d, axis=0, keepdims=True)                 # (1, T)
    # The same k attains min distance and max logit, so dmin doubles as the
    # softmax shift: exp(-scale*d + scale*dmin).
    exps = jnp.exp((dmin - d) * scale)                       # (K, T)
    denom = jnp.sum(exps, axis=0, keepdims=True)             # (1, T)
    probs = exps * pl.reciprocal(denom, approx=True)         # (K, T)

    if flg_soft:
        # TODO(synk): stochastic Gumbel-softmax sampling (train path) omitted;
        # deterministic soft assignment is used instead.
        enc = probs.astype(cbt_ref.dtype)
    else:
        # TODO(synk): Categorical sampling for flg_quant_det=False omitted;
        # falls back to the deterministic argmin path.
        k_ids = jax.lax.broadcasted_iota(jnp.int32, d.shape, 0)
        masked_ids = jnp.where(d == dmin, k_ids, kp)
        first_min = jnp.min(masked_ids, axis=0, keepdims=True)
        enc = (k_ids == first_min).astype(cbt_ref.dtype)     # first-argmin 1-hot

    # z_q = E^T @ enc -> (D, T); f32 codebook on the deterministic path so the
    # output reproduces exact codebook rows. Store is lane-dense (T in lanes).
    zq = jax.lax.dot_general(
        cbt_ref[...], enc, (((1,), (0,)), ((), ())),
        preferred_element_type=jnp.float32)
    zq_ref[0] = zq.astype(zq_ref.dtype)

    # min ||z - e||^2 = d'min + ||z||^2 (add the dropped per-position term).
    z_sq = jnp.sum(z * z, axis=0, keepdims=True)             # (1, T)
    dist_min = jnp.maximum(dmin + z_sq, 0.0)                 # clamp cancellation

    if needs_mask:
        lane = jax.lax.broadcasted_iota(jnp.int32, (1, tile_hw), 1)
        valid = (pl.program_id(1) * tile_hw + lane) < hw_valid
        probs = jnp.where(valid, probs, 0.0)
        dist_min = jnp.where(valid, dist_min, 0.0)

    # Tiny per-tile partial sums (written once, no sublane broadcasts).
    psum_ref[0, 0] = jnp.sum(probs, axis=1, keepdims=True)   # (K, 1)
    msum_ref[0, 0] = jnp.sum(dist_min, keepdims=True) * prec  # (1, 1)


def vector_quantize(z_from_encoder, param_q, codebook, *, temperature=0.5,
                    flg_train=False, flg_quant_det=True,
                    max_tile_hw=2048, matmul_dtype=jnp.bfloat16):
    """Forward pass of VectorQuantizer.

    z_from_encoder: (B, C, H, W) float32, C == dim_dict  (PyTorch NCHW layout)
    param_q:        (1,) float32 log-variance parameter
    codebook:       (size_dict, dim_dict) float32
    Returns (z_quantized NCHW, loss scalar, perplexity scalar).
    """
    B, C, H, W = z_from_encoder.shape
    K, D = codebook.shape
    assert C == D, "channel dim must equal dim_dict"
    HW = H * W
    N = B * HW

    k_pad = _round_up(K, 8)
    tile_hw = _pick_tile_hw(HW, k_pad, max_tile_hw)
    hw_pad = _round_up(HW, tile_hw)
    num_t = hw_pad // tile_hw

    # No transposes: NCHW is consumed as a (B, C, H*W) view; the kernel is
    # channels-in-sublanes / positions-in-lanes.
    z3 = z_from_encoder.reshape(B, C, HW).astype(jnp.float32)
    if hw_pad != HW:
        z3 = jnp.pad(z3, ((0, 0), (0, 0), (0, hw_pad - HW)))

    cb = codebook.astype(jnp.float32)
    e_sq = jnp.sum(cb * cb, axis=-1, keepdims=True)          # (K, 1) hoisted
    if k_pad != K:
        cb = jnp.pad(cb, ((0, k_pad - K), (0, 0)))
        e_sq = jnp.pad(e_sq, ((0, k_pad - K), (0, 0)), constant_values=1e30)
    cb2_mm = (2.0 * cb).astype(matmul_dtype)                 # x2 folded (exact)
    flg_soft = bool(flg_train)
    cbt = cb.T if not flg_soft else cb.T.astype(matmul_dtype)

    prec = jnp.exp(-param_q.reshape(()).astype(jnp.float32))
    scalars = jnp.stack([prec, prec / jnp.float32(temperature)]).reshape(1, 2)

    kernel = functools.partial(
        _vq_kernel, tile_hw=tile_hw, hw_valid=HW,
        needs_mask=(hw_pad != HW), flg_soft=flg_soft)

    zq_pad, psum, msum = pl.pallas_call(
        kernel,
        out_shape=(
            jax.ShapeDtypeStruct((B, C, hw_pad), jnp.float32),
            jax.ShapeDtypeStruct((B, num_t, k_pad, 1), jnp.float32),
            jax.ShapeDtypeStruct((B, num_t, 1, 1), jnp.float32),
        ),
        grid_spec=pltpu.PrefetchScalarGridSpec(
            num_scalar_prefetch=0,
            grid=(B, num_t),
            in_specs=[
                pl.BlockSpec(memory_space=pltpu.MemorySpace.SMEM),   # scalars
                pl.BlockSpec((1, C, tile_hw), lambda b, t: (b, 0, t)),  # z tile
                pl.BlockSpec((k_pad, D), lambda b, t: (0, 0)),       # 2*codebook (bf16)
                pl.BlockSpec((k_pad, 1), lambda b, t: (0, 0)),       # ||e||^2
                pl.BlockSpec((D, k_pad), lambda b, t: (0, 0)),       # codebook^T
            ],
            out_specs=[
                pl.BlockSpec((1, C, tile_hw), lambda b, t: (b, 0, t)),   # z_q
                pl.BlockSpec((1, 1, k_pad, 1), lambda b, t: (b, t, 0, 0)),  # prob partials
                pl.BlockSpec((1, 1, 1, 1), lambda b, t: (b, t, 0, 0)),   # dist partials
            ],
        ),
        compiler_params=pltpu.CompilerParams(
            dimension_semantics=("parallel", "parallel"),
            vmem_limit_bytes=32 * 1024 * 1024),
    )(scalars, z3, cb2_mm, e_sq, cbt)

    z_q = zq_pad[:, :, :HW].reshape(B, C, H, W)

    # loss = mean over all N positions of precision * min ||z - e||^2.
    loss = jnp.sum(msum) / jnp.float32(N)
    avg_probs = jnp.sum(psum[..., 0], axis=(0, 1))[:K] / jnp.float32(N)
    perplexity = jnp.exp(-jnp.sum(avg_probs * jnp.log(avg_probs + 1e-7)))
    return z_q, loss, perplexity


if __name__ == "__main__":
    # Module config: size_dict (codebook entries), dim_dict (embedding dim)
    size_dict, dim_dict = 64, 32
    temperature = 0.5

    key = jax.random.PRNGKey(0)
    k1, k2 = jax.random.split(key, 2)

    B, H, W = 2, 8, 8
    z_from_encoder = jax.random.normal(k1, (B, dim_dict, H, W), jnp.float32)  # NCHW
    codebook = 0.1 * jax.random.normal(k2, (size_dict, dim_dict), jnp.float32)
    param_q = jnp.zeros((1,), jnp.float32)  # deterministic log-variance init

    z_q, loss, perplexity = vector_quantize(
        z_from_encoder, param_q, codebook,
        temperature=temperature, flg_train=False, flg_quant_det=True)

    jax.block_until_ready((z_q, loss, perplexity))
    assert z_q.shape == z_from_encoder.shape
    assert bool(jnp.isfinite(loss)) and bool(jnp.isfinite(perplexity))
    print("KERNEL_OK")
</pallas_src>

<mosaic_0001>
module attributes {stable_mosaic.version = 11 : i64} {
  func.func @_vq_kernel(%arg0: i32, %arg1: i32, %arg2: memref<1x2xf32, #tpu.memory_space<smem>>, %arg3: memref<1x32x64xf32, #tpu.memory_space<vmem>>, %arg4: memref<64x32xbf16, #tpu.memory_space<vmem>>, %arg5: memref<64x1xf32, #tpu.memory_space<vmem>>, %arg6: memref<32x64xf32, #tpu.memory_space<vmem>>, %arg7: memref<1x32x64xf32, #tpu.memory_space<vmem>>, %arg8: memref<1x1x64x1xf32, #tpu.memory_space<vmem>>, %arg9: memref<1x1x1x1xf32, #tpu.memory_space<vmem>>) attributes {dimension_semantics = [#tpu.dimension_semantics<parallel>, #tpu.dimension_semantics<parallel>], iteration_bounds = array<i64: 2, 1>, scalar_prefetch = 0 : i64, scratch_operands = 0 : i64, tpu.core_type = #tpu.core_type<tc>, window_params = [{transform_indices = @transform_0, window_bounds = array<i64: 1, 2>}, {transform_indices = @transform_1, window_bounds = array<i64: 1, 32, 64>}, {pipeline_mode = #tpu.pipeline_mode<synchronous>, transform_indices = @transform_2, window_bounds = array<i64: 64, 32>}, {pipeline_mode = #tpu.pipeline_mode<synchronous>, transform_indices = @transform_3, window_bounds = array<i64: 64, 1>}, {pipeline_mode = #tpu.pipeline_mode<synchronous>, transform_indices = @transform_4, window_bounds = array<i64: 32, 64>}, {transform_indices = @transform_5, window_bounds = array<i64: 1, 32, 64>}, {transform_indices = @transform_6, window_bounds = array<i64: 1, 1, 64, 1>}, {transform_indices = @transform_7, window_bounds = array<i64: 1, 1, 1, 1>}]} {
    %c0 = arith.constant 0 : index
    %c0_0 = arith.constant 0 : index
    %0 = memref.load %arg2[%c0, %c0_0] : memref<1x2xf32, #tpu.memory_space<smem>>
    %c0_1 = arith.constant 0 : index
    %c1 = arith.constant 1 : index
    %1 = memref.load %arg2[%c0_1, %c1] : memref<1x2xf32, #tpu.memory_space<smem>>
    %c0_2 = arith.constant 0 : index
    %c0_3 = arith.constant 0 : index
    %c0_4 = arith.constant 0 : index
    %2 = vector.load %arg3[%c0_2, %c0_3, %c0_4] : memref<1x32x64xf32, #tpu.memory_space<vmem>>, vector<1x32x64xf32>
    %3 = vector.shape_cast %2 : vector<1x32x64xf32> to vector<32x64xf32>
    %c0_5 = arith.constant 0 : index
    %c0_6 = arith.constant 0 : index
    %4 = vector.load %arg4[%c0_5, %c0_6] : memref<64x32xbf16, #tpu.memory_space<vmem>>, vector<64x32xbf16>
    %5 = arith.truncf %3 : vector<32x64xf32> to vector<32x64xbf16>
    %cst = arith.constant dense<0.000000e+00> : vector<64x64xf32>
    %6 = tpu.matmul %4, %5, %cst {dimension_numbers = #tpu.dot_dimension_numbers<[1], [0], [0], [1], [0, 0, 1, 1], [], []>} : vector<64x32xbf16>, vector<32x64xbf16>, vector<64x64xf32> -> vector<64x64xf32>
    %c0_7 = arith.constant 0 : index
    %c0_8 = arith.constant 0 : index
    %7 = vector.load %arg5[%c0_7, %c0_8] : memref<64x1xf32, #tpu.memory_space<vmem>>, vector<64x1xf32>
    %8 = vector.broadcast %7 : vector<64x1xf32> to vector<64x64xf32>
    %9 = arith.subf %8, %6 : vector<64x64xf32>
    %cst_9 = arith.constant dense<0x7F800000> : vector<64xf32>
    %10 = vector.multi_reduction <minimumf>, %9, %cst_9 [0] : vector<64x64xf32> to vector<64xf32>
    %11 = vector.shape_cast %10 : vector<64xf32> to vector<1x64xf32>
    %12 = vector.broadcast %11 : vector<1x64xf32> to vector<64x64xf32>
    %13 = arith.subf %12, %9 : vector<64x64xf32>
    %14 = vector.broadcast %1 : f32 to vector<64x64xf32>
    %15 = arith.mulf %13, %14 : vector<64x64xf32>
    %16 = math.exp %15 : vector<64x64xf32>
    %cst_10 = arith.constant dense<0.000000e+00> : vector<64xf32>
    %17 = vector.multi_reduction <add>, %16, %cst_10 [0] : vector<64x64xf32> to vector<64xf32>
    %18 = vector.shape_cast %17 : vector<64xf32> to vector<1x64xf32>
    %19 = tpu.reciprocal %18 {approx = true} : vector<1x64xf32> -> vector<1x64xf32>
    %20 = vector.broadcast %19 : vector<1x64xf32> to vector<64x64xf32>
    %21 = arith.mulf %16, %20 : vector<64x64xf32>
    %22 = tpu.iota {dimensions = array<i32: 0>} : vector<64x64xi32>
    %23 = vector.broadcast %11 : vector<1x64xf32> to vector<64x64xf32>
    %24 = arith.cmpf oeq, %9, %23 : vector<64x64xf32>
    %c64_i32 = arith.constant 64 : i32
    %25 = vector.broadcast %c64_i32 : i32 to vector<64x64xi32>
    %26 = arith.select %24, %22, %25 : vector<64x64xi1>, vector<64x64xi32>
    %cst_11 = arith.constant dense<2147483647> : vector<64xi32>
    %27 = vector.multi_reduction <minsi>, %26, %cst_11 [0] : vector<64x64xi32> to vector<64xi32>
    %28 = vector.shape_cast %27 : vector<64xi32> to vector<1x64xi32>
    %29 = vector.broadcast %28 : vector<1x64xi32> to vector<64x64xi32>
    %30 = arith.cmpi eq, %22, %29 : vector<64x64xi32>
    %31 = arith.extui %30 : vector<64x64xi1> to vector<64x64xi32>
    %32 = arith.sitofp %31 : vector<64x64xi32> to vector<64x64xf32>
    %c0_12 = arith.constant 0 : index
    %c0_13 = arith.constant 0 : index
    %33 = vector.load %arg6[%c0_12, %c0_13] : memref<32x64xf32, #tpu.memory_space<vmem>>, vector<32x64xf32>
    %cst_14 = arith.constant dense<0.000000e+00> : vector<32x64xf32>
    %34 = tpu.matmul %33, %32, %cst_14 {dimension_numbers = #tpu.dot_dimension_numbers<[1], [0], [0], [1], [0, 0, 1, 1], [], []>} : vector<32x64xf32>, vector<64x64xf32>, vector<32x64xf32> -> vector<32x64xf32>
    %c0_15 = arith.constant 0 : index
    %c0_16 = arith.constant 0 : index
    %c0_17 = arith.constant 0 : index
    %35 = vector.load %arg7[%c0_15, %c0_16, %c0_17] : memref<1x32x64xf32, #tpu.memory_space<vmem>>, vector<1x32x64xf32>
    %36 = vector.shape_cast %35 : vector<1x32x64xf32> to vector<32x64xf32>
    %37 = vector.shape_cast %34 : vector<32x64xf32> to vector<1x32x64xf32>
    tpu.vector_store %arg7[%c0_15, %c0_16, %c0_17], %37 {strides = array<i32>} : memref<1x32x64xf32, #tpu.memory_space<vmem>>, vector<1x32x64xf32>,
    %38 = arith.mulf %3, %3 : vector<32x64xf32>
    %cst_18 = arith.constant dense<0.000000e+00> : vector<64xf32>
    %39 = vector.multi_reduction <add>, %38, %cst_18 [0] : vector<32x64xf32> to vector<64xf32>
    %40 = vector.shape_cast %39 : vector<64xf32> to vector<1x64xf32>
    %41 = arith.addf %11, %40 : vector<1x64xf32>
    %cst_19 = arith.constant 0.000000e+00 : f32
    %42 = vector.broadcast %cst_19 : f32 to vector<1x64xf32>
    %43 = arith.maximumf %41, %42 : vector<1x64xf32>
    %cst_20 = arith.constant dense<0.000000e+00> : vector<64xf32>
    %44 = vector.multi_reduction <add>, %21, %cst_20 [1] : vector<64x64xf32> to vector<64xf32>
    %45 = vector.shape_cast %44 : vector<64xf32> to vector<64x1xf32>
    %c0_21 = arith.constant 0 : index
    %c0_22 = arith.constant 0 : index
    %c0_23 = arith.constant 0 : index
    %c0_24 = arith.constant 0 : index
    %46 = vector.load %arg8[%c0_21, %c0_22, %c0_23, %c0_24] : memref<1x1x64x1xf32, #tpu.memory_space<vmem>>, vector<1x1x64x1xf32>
    %47 = vector.shape_cast %46 : vector<1x1x64x1xf32> to vector<64x1xf32>
    %48 = vector.shape_cast %45 : vector<64x1xf32> to vector<1x1x64x1xf32>
    tpu.vector_store %arg8[%c0_21, %c0_22, %c0_23, %c0_24], %48 {strides = array<i32>} : memref<1x1x64x1xf32, #tpu.memory_space<vmem>>, vector<1x1x64x1xf32>,
    %49 = vector.shape_cast %43 : vector<1x64xf32> to vector<1x1x64xf32>
    %cst_25 = arith.constant dense<0.000000e+00> : vector<1xf32>
    %50 = vector.multi_reduction <add>, %49, %cst_25 [1, 2] : vector<1x1x64xf32> to vector<1xf32>
    %51 = vector.shape_cast %50 : vector<1xf32> to vector<1x1x1xf32>
    %52 = vector.extract %51[0, 0, 0] : f32 from vector<1x1x1xf32>
    %53 = vector.broadcast %52 : f32 to vector<1x1xf32>
    %54 = vector.broadcast %0 : f32 to vector<1x1xf32>
    %55 = arith.mulf %53, %54 : vector<1x1xf32>
    %c0_26 = arith.constant 0 : index
    %c0_27 = arith.constant 0 : index
    %c0_28 = arith.constant 0 : index
    %c0_29 = arith.constant 0 : index
    %56 = vector.load %arg9[%c0_26, %c0_27, %c0_28, %c0_29] : memref<1x1x1x1xf32, #tpu.memory_space<vmem>>, vector<1x1x1x1xf32>
    %57 = vector.shape_cast %56 : vector<1x1x1x1xf32> to vector<1x1xf32>
    %58 = vector.shape_cast %55 : vector<1x1xf32> to vector<1x1x1x1xf32>
    tpu.vector_store %arg9[%c0_26, %c0_27, %c0_28, %c0_29], %58 {strides = array<i32>} : memref<1x1x1x1xf32, #tpu.memory_space<vmem>>, vector<1x1x1x1xf32>,
    return
  }
  func.func @transform_0(%arg0: i32, %arg1: i32) -> (i32, i32) {
    %c0_i32 = arith.constant 0 : i32
    %c0_i32_0 = arith.constant 0 : i32
    %c0_i32_1 = arith.constant 0 : i32
    return %c0_i32, %c0_i32_0 : i32, i32
  }
  func.func @transform_1(%arg0: i32, %arg1: i32) -> (i32, i32, i32) {
    %c0_i32 = arith.constant 0 : i32
    %c0_i32_0 = arith.constant 0 : i32
    return %arg0, %c0_i32, %arg1 : i32, i32, i32
  }
  func.func @transform_2(%arg0: i32, %arg1: i32) -> (i32, i32) {
    %c0_i32 = arith.constant 0 : i32
    %c0_i32_0 = arith.constant 0 : i32
    %c0_i32_1 = arith.constant 0 : i32
    return %c0_i32, %c0_i32_0 : i32, i32
  }
  func.func @transform_3(%arg0: i32, %arg1: i32) -> (i32, i32) {
    %c0_i32 = arith.constant 0 : i32
    %c0_i32_0 = arith.constant 0 : i32
    %c0_i32_1 = arith.constant 0 : i32
    return %c0_i32, %c0_i32_0 : i32, i32
  }
  func.func @transform_4(%arg0: i32, %arg1: i32) -> (i32, i32) {
    %c0_i32 = arith.constant 0 : i32
    %c0_i32_0 = arith.constant 0 : i32
    %c0_i32_1 = arith.constant 0 : i32
    return %c0_i32, %c0_i32_0 : i32, i32
  }
  func.func @transform_5(%arg0: i32, %arg1: i32) -> (i32, i32, i32) {
    %c0_i32 = arith.constant 0 : i32
    %c0_i32_0 = arith.constant 0 : i32
    return %arg0, %c0_i32, %arg1 : i32, i32, i32
  }
  func.func @transform_6(%arg0: i32, %arg1: i32) -> (i32, i32, i32, i32) {
    %c0_i32 = arith.constant 0 : i32
    %c0_i32_0 = arith.constant 0 : i32
    %c0_i32_1 = arith.constant 0 : i32
    return %arg0, %arg1, %c0_i32, %c0_i32_0 : i32, i32, i32, i32
  }
  func.func @transform_7(%arg0: i32, %arg1: i32) -> (i32, i32, i32, i32) {
    %c0_i32 = arith.constant 0 : i32
    %c0_i32_0 = arith.constant 0 : i32
    %c0_i32_1 = arith.constant 0 : i32
    return %arg0, %arg1, %c0_i32, %c0_i32_0 : i32, i32, i32, i32
  }
}

</mosaic_0001>

<bundles_post_ra>
// kernel: tpu_custom_call.1
= control target key start
LH: loop header
LB: loop body
LE: loop exit
PB: predicated region body
PF: predicated region fallthrough
CT: control target
= control target key end

     0   :  { %13 = vsyncpa [#allocation4], 0  ;;  %s1755_s0 = inlined_call_operand.vmem [shape: f32[1,2], index: 0, kind: input, shape index: {}]   ;;  %s1756_s1 = inlined_call_operand.vmem [shape: f32[2,32,64], index: 1, kind: input, shape index: {}]   ;;  %s1757_s2 = inlined_call_operand.vmem [shape: bf16[64,32], index: 2, kind: input, shape index: {}]   ;;  %s1758_s3 = inlined_call_operand.vmem [shape: f32[64,1], index: 3, kind: input, shape index: {}]   ;;  %s1759_s4 = inlined_call_operand.vmem [shape: f32[32,64], index: 4, kind: input, shape index: {}]   ;;  %s1760_s5 = inlined_call_operand.hbm [shape: f32[2,32,64], index: 5, kind: output, shape index: {0}]   ;;  %s1761_s6 = inlined_call_operand.vmem [shape: f32[2,1,64,1], index: 6, kind: output, shape index: {1}]   ;;  %s1762_s7 = inlined_call_operand.vmem [shape: f32[2,1,1,1], index: 7, kind: output, shape index: {2}]  }
   0x1   :  { %14 = vsyncpa [#allocation3], 0 }
   0x2   :  { %16 = vsyncpa [#allocation3 + $0x1], 0  ;;  %s1397_s24 = smov 0   ;;  %s1399_s25 = smov 0  }
   0x3   :  { %s1401_s26 = smov 0   ;;  %s1403_s27 = smov 0  }
   0x4   :  { %s1405_s28 = smov 0   ;;  %s1407_s29 = smov 0  }
   0x5 LB: > { %s1057_s30 = sadd.s32 4294967295, %s1349_s29   ;;  %s1058_s8 = sadd.s32 4294967294, %s1349_s29   ;;  %s1349_s29 = sphi %s1407_s29, %s22_s29   ;;  %s1345_s28 = sphi %s1405_s28, %s1771_s28   ;;  %s1341_s27 = sphi %s1403_s27, %s1770_s27   ;;  %s1337_s26 = sphi %s1401_s26, %s1769_s26   ;;  %s1333_s25 = sphi %s1399_s25, %s1768_s25   ;;  %s1329_s24 = sphi %s1397_s24, %s1767_s24  }
   0x6   : > { %s34_s9 = sadd.s32 1, %s1345_s28  ;;  %s155_s10 = sadd.s32 1, %s1337_s26 }
   0x7   : > { %p36_p0 = scmp.ge.s32.totalorder %s34_s9, 2  ;;  %p165_p1 = scmp.ne.s32.totalorder %s1337_s26, %s1333_s25 }
   0x8   : > { %p166_p2 = scmp.eq.s32.totalorder %s1057_s30, 1  ;;  %p171_p3 = scmp.ne.s32.totalorder %s1333_s25, %s1329_s24 }
   0x9   : > { %s1773_s9 = smov (%p36_p0, %s34_s9), 0  ;;  %p172_p5 = scmp.eq.s32.totalorder %s1058_s8, 1 }
   0xa   : > { %p1437_p4 = por %p166_p2, %p165_p1  ;;  %s150_s12 = ssub.s32 %s1345_s28, %s1773_s9 }
   0xb   : > { %p1059_p6 = scmp.ge.s32.totalorder %s1349_s29, 1  ;;  %p153_p7 = scmp.eq.s32.totalorder %s150_s12, 0 }
   0xc   : > { %p1444_p8 = por %p172_p5, %p171_p3  ;;  %p235_p9 = scmp.lt.s32.totalorder %s1349_s29, 3 }
   0xd   : > { %s1450_s14 = scalar_select %p153_p7, %s1337_s26, %s155_s10  }
   0xe   : > { %p1452_p10 = pnand %p1059_p6, %p235_p9  ;;  %p1456_p11 = scmp.eq.s32.totalorder %s1057_s30, 0 }
   0xf   : > { %s248_s19 = sshll.u32 %s1755_s0, 4  ;;  %s249_s19 = int_to_ptr.vmem [resolvable:$true] %s248_s19 }
  0x10   : > { %p1166_p12 = pneg %p1452_p10  ;;  %s1254_s20 = scalar_lea.vmem %s249_s19, 16 }
  0x11   : > { %p1255_p0 = scmp.ne.s32.totalorder %s249_s19, %s1254_s20  ;;  %p1262_p5 = scmp.lt.s32.totalorder %s249_s19, %s249_s19 }
  0x12   : > { %p1167_p13 = pnand %p1456_p11, %p1166_p12  ;;  %p1263_p6 = scmp.lt.s32.totalorder %s1254_s20, %s1254_s20 }
  0x14   : > { %p1256_p1 = pneg %p1167_p13  ;;  %p1264_p7 = por %p1263_p6, %p1262_p5 }
  0x16   : > { %p1257_p2 = pnand %p1256_p1, %p1255_p0 }
  0x18   : > { %p1258_p3 = pneg %p1257_p2 }
  0x1a   : > { %p1265_p9 = pnand %p1264_p7, %p1258_p3 }
  0x1c   : > { %1268 = shalt.err (!%p1265_p9)
}
  0x1d   : > { %s1351_s21 = smov [#allocation2]   ;;  %281 = sbr.rel (%p1452_p10) target bundleno = 541 (0x21d), region = 40 }
  0x1e   : > { %1169 = dma.vmem_to_smem (!%p1167_p13), %s249_s19, 16, %s1351_s21, [#allocation4]  }
  0x22   : > { %1320 = dma.done.wait (%p1456_p11), [#allocation4], 16  }
  0x23   : > { %1322 = vsyncadd (%p1456_p11), [#allocation4], 4294967280 }
  0x24   : > { %287 = sfence }
  0x25   : > { %p332_p12 = scmp.lt.s32.totalorder %s1341_s27, 1  ;;  %v1232_v0 = vld [vmem:[%s1757_s2] sm:$0xff]   ;;  %vm392_vm0 = vcmask 261120   ;;  %v1352_v1 = vmov 0   ;;  %v472_v2 = vld [vmem:[%s1758_s3 + $0x10] sm:$0xff]  ;;  %v473_v4 = vld [vmem:[%s1758_s3 + $0x18] sm:$0xff] }
  0x26   : > { %1128 = vmatprep.mubr.msk.bf16.mxu0 %vm392_vm0, %v1232_v0  ;;  %1231 = vset.pattern.permute.xlu1 %v1352_v1  ;;  %v470_v3 = vld [vmem:[%s1758_s3] sm:$0xff]  ;;  %v471_v12 = vld [vmem:[%s1758_s3 + $0x8] sm:$0xff]  ;;  %vm526_vm1 = vcmask 523264   ;;  %v1234_v23 = vld [vmem:[%s1757_s2 + $0x10] sm:$0xff]   ;;  %s1069_s16 = sld [smem:[#allocation2 + $0x1]]  ;;  %vm848_vm8 = vcmask 516096  }
  0x27   : > { %s1478_s30 = scalar_select %p332_p12, %s1341_s27, 1  ;;  %1230 = vset.pattern.permute.xlu0 %v1352_v1  ;;  %490 = vperm.xlu1 %1231, %v472_v2   ;;  %v475_v18 = vld [vmem:[%s1758_s3 + $0x28] sm:$0xff]  ;;  %v474_v20 = vld [vmem:[%s1758_s3 + $0x20] sm:$0xff]  ;;  %v477_v24 = vld [vmem:[%s1758_s3 + $0x38] sm:$0xff] }
  0x28   : > { %480 = vperm.xlu0 %1230, %v470_v3   ;;  %v1233_v22 = vld [vmem:[%s1757_s2 + $0x8] sm:$0xff]   ;;  %v476_v25 = vld [vmem:[%s1758_s3 + $0x30] sm:$0xff]  ;;  %v1235_v26 = vld [vmem:[%s1757_s2 + $0x18] sm:$0xff]   ;;  %s356_s23 = sld [smem:[#allocation2]] }
  0x29   : > { %s1103_s8 = sshll.u32 %s1478_s30, 5  ;;  %v691_v30 = vld [vmem:[%s1759_s4] sm:$0xff] }
  0x2a   : > { %s339_s19 = scalar_lea.vmem %s1756_s1, %s1103_s8  ;;  %1152 = vmatprep.mubr.msk.f32.mxu1 %vm526_vm1, %v691_v30  ;;  %s1104_s8 = sshll.u32 %s1478_s30, 6 }
  0x2b   : > { %v360_v5 = vld [vmem:[%s339_s19 + $0x10] sm:$0xff]  ;;  %v361_v6 = vld [vmem:[%s339_s19 + $0x18] sm:$0xff]  ;;  %v358_v7 = vld [vmem:[%s339_s19] sm:$0xff]  ;;  %495 = vperm.xlu1 %1231, %v473_v4  }
  0x2c   : > { %v371_v8 = vpack.c.bf16 %v361_v6, %v360_v5  ;;  %v798_v9 = vmul.f32 %v360_v5, %v360_v5  ;;  %v359_v10 = vld [vmem:[%s339_s19 + $0x8] sm:$0xff]  ;;  %v796_v11 = vmul.f32 %v358_v7, %v358_v7  ;;  %485 = vperm.xlu0 %1230, %v471_v12   ;;  %v799_v27 = vmul.f32 %v361_v6, %v361_v6  ;;  %s348_s19 = scalar_lea.vmem %s1761_s6, %s1104_s8 }
  0x2d   : > { %v370_v13 = vpack.c.bf16 %v359_v10, %v358_v7  ;;  %v797_v14 = vmul.f32 %v359_v10, %v359_v10 }
  0x2e   : > { %1124 = vmatprep.subr.bf16.mxu0 %v371_v8  ;;  %v800_v15 = vsel %vm526_vm1, %v796_v11, 0.0  ;;  %v803_v16 = vsel %vm526_vm1, %v798_v9, 0.0  ;;  %v805_v28 = vsel %vm526_vm1, %v799_v27, 0.0 }
  0x2f   : > { %1125 = vmatpush3.bf16.msra.mxu0 %v371_v8  ;;  %v801_v17 = vsel %vm526_vm1, %v797_v14, 0.0  ;;  %505 = vperm.xlu1 %1231, %v475_v18  }
  0x30   : > { %1126 = vmatprep.subr.bf16.mxu0 %v370_v13  ;;  %v802_v19 = vadd.f32 %v801_v17, %v800_v15  ;;  %500 = vperm.xlu0 %1230, %v474_v20  }
  0x32   : > { %v804_v21 = vadd.f32 %v803_v16, %v802_v19 }
  0x33   : > { %1127 = vmatpush3.bf16.msra.mxu0 %v370_v13  ;;  %515 = vperm.xlu1 %1231, %v477_v24   ;;  %v611_v13 = vlaneseq }
  0x34   : > { %510 = vperm.xlu0 %1230, %v476_v25   ;;  %v806_v29 = vadd.f32 %v805_v28, %v804_v21 }
  0x35   : > { %v1558_v16 = vshrl.u32 %v611_v13, 7 }
  0x36   : > { %1129 = vmatmul.mubr.msk.bf16.vlgmr.msra.gmra.mxu0 %vm392_vm0, %v1233_v22  ;;  %v807_v5 = vrot.slane %v806_v29, 4 }
  0x37   : > { %1132 = vmatprep.mubr.msk.bf16.mxu0 %vm392_vm0, %v1234_v23  ;;  %v1563_v19 = vadd.s32 8, %v1558_v16  ;;  %v1566_v20 = vadd.s32 32, %v1558_v16  ;;  %v1569_v21 = vadd.s32 40, %v1558_v16  ;;  %v1575_v23 = vstv %s1069_s16  ;;  %s354_s16 = scalar_lea.vmem %s1762_s7, %s1478_s30  ;;  %s310_s30 = sand.u32 1, %s1333_s25  }
  0x38   : > { %v808_v8 = vadd.f32 %v807_v5, %v806_v29  ;;  %v1582_v25 = vadd.s32 16, %v1558_v16  ;;  %v1590_v29 = vadd.s32 48, %v1558_v16  ;;  %v1593_v30 = vadd.s32 56, %v1558_v16  ;;  %s1064_s20 = sshll.u32 %s310_s30, 5  ;;  %s1710_s15 = scalar_lea.sflag [#allocation3], %s310_s30 }
  0x39   : > { %s312_s21 = scalar_lea.vmem [#allocation5], %s1064_s20 }
  0x3a   : > { %v809_v11 = vrot.slane %v808_v8, 2  ;;  %s894_s22 = sshll.u32 %s312_s21, 4  ;;  %s1701_s22 = int_to_ptr.vmem [resolvable:$true] %s894_s22 }
  0x3c   : > { %v810_v15 = vadd.f32 %v809_v11, %v808_v8 }
  0x3e   : > { %1133 = vmatmul.mubr.msk.bf16.gmra.mxu0 %vm392_vm0, %v1235_v26  ;;  %v811_v18 = vrot.slane %v810_v15, 1  ;;  %v1585_v26 = vadd.s32 24, %v1558_v16 }
  0x40   : > { %v812_v24 = vadd.f32 %v811_v18, %v810_v15 }
  0xa2   : > { %v491_v32 = vpop.permute.xlu1 %490 }
  0xa3   : > { %v481_v31 = vpop.permute.xlu0 %480 }
  0xa6   : > { %v496_v34 = vpop.permute.xlu1 %495 }
  0xa7   : > { %v486_v33 = vpop.permute.xlu0 %485 }
  0xaa   : > { %v506_v39 = vpop.permute.xlu1 %505 }
  0xab   : > { %v501_v37 = vpop.permute.xlu0 %500 }
  0xae   : > { %v516_v47 = vpop.permute.xlu1 %515 }
  0xaf   : > { %v511_v42 = vpop.permute.xlu0 %510 }
  0xf6   : > { %v1130_v35 = vpop.f32.mrf.mxu0 }
  0xf7   : > { %v1535_v49 = vsub.f32 %v491_v32, %v1130_v35 }
  0xf8   : > { %v439_v36 = vpop.f32.mrf.mxu0 }
  0xf9   : > { %v518_v50 = vsub.f32 %v481_v31, %v439_v36  ;;  %v529_v60 = vsel %vm526_vm1, %v1535_v49, inf }
  0xfa   : > { %v1131_v38 = vpop.f32.mrf.mxu0 }
  0xfb   : > { %v1529_v43 = vsub.f32 %v496_v34, %v1131_v38  ;;  %v527_v61 = vsel %vm526_vm1, %v518_v50, inf }
  0xfc   : > { %v442_v40 = vpop.f32.mrf.mxu0 }
  0xfd   : > { %v1537_v51 = vsub.f32 %v486_v33, %v442_v40  ;;  %v530_v53 = vsel %vm526_vm1, %v1529_v43, inf }
  0xfe   : > { %v1134_v41 = vpop.f32.mrf.mxu0 }
  0xff   : > { %v1531_v45 = vsub.f32 %v511_v42, %v1134_v41  ;;  %v528_v62 = vsel %vm526_vm1, %v1537_v51, inf }
 0x100   : > { %v455_v44 = vpop.f32.mrf.mxu0 }
 0x101   : > { %v1533_v46 = vsub.f32 %v501_v37, %v455_v44  ;;  %v535_v55 = vsel %vm526_vm1, %v1531_v45, inf }
 0x102   : > { %v1135_v48 = vpop.f32.mrf.mxu0  ;;  %v536_v0 = vmin.f32 %v529_v60, %v535_v55 }
 0x103   : > { %v1539_v52 = vsub.f32 %v516_v47, %v1135_v48  ;;  %v531_v56 = vsel %vm526_vm1, %v1533_v46, inf }
 0x104   : > { %v458_v54 = vpop.f32.mrf.mxu0  ;;  %v532_v1 = vmin.f32 %v527_v61, %v531_v56 }
 0x105   : > { %v537_v57 = vsel %vm526_vm1, %v1539_v52, inf  ;;  %v1549_v58 = vsub.f32 %v506_v39, %v458_v54 }
 0x106   : > { %v538_v59 = vmin.f32 %v530_v53, %v537_v57 }
 0x107   : > { %v533_v63 = vsel %vm526_vm1, %v1549_v58, inf }
 0x108   : > { %v534_v2 = vmin.f32 %v528_v62, %v533_v63  ;;  %v540_v3 = vmin.f32 %v536_v0, %v538_v59 }
 0x10a   : > { %v539_v4 = vmin.f32 %v532_v1, %v534_v2 }
 0x10c   : > { %v541_v6 = vmin.f32 %v539_v4, %v540_v3 }
 0x10e   : > { %v542_v7 = vrot.slane %v541_v6, 4 }
 0x110   : > { %v543_v9 = vmin.f32 %v541_v6, %v542_v7 }
 0x112   : > { %v544_v10 = vrot.slane %v543_v9, 2 }
 0x114   : > { %v545_v12 = vmin.f32 %v543_v9, %v544_v10 }
 0x116   : > { %v546_v14 = vrot.slane %v545_v12, 1 }
 0x118   : > { %v1560_v17 = vmin.f32 %v545_v12, %v546_v14 }
 0x11a   : > { %vm620_vm2 = vcmp.eq.f32.partialorder %v518_v50, %v1560_v17  ;;  %vm621_vm3 = vcmp.eq.f32.partialorder %v1537_v51, %v1560_v17  ;;  %v548_v22 = vsub.f32 %v1560_v17, %v518_v50  ;;  %vm624_vm4 = vcmp.eq.f32.partialorder %v1533_v46, %v1560_v17 }
 0x11b   : > { %vm625_vm5 = vcmp.eq.f32.partialorder %v1549_v58, %v1560_v17  ;;  %v628_v27 = vsel %vm620_vm2, %v1558_v16, 64  ;;  %v629_v28 = vsel %vm621_vm3, %v1563_v19, 64  ;;  %v550_v31 = vsub.f32 %v1560_v17, %v1535_v49 }
 0x11c   : > { %v632_v32 = vsel %vm624_vm4, %v1566_v20, 64  ;;  %v633_v33 = vsel %vm625_vm5, %v1569_v21, 64  ;;  %v636_v34 = vsel %vm526_vm1, %v628_v27, 2147483647  ;;  %v557_v35 = vmul.f32 %v1575_v23, %v548_v22 }
 0x11d   : > { %v637_v36 = vsel %vm526_vm1, %v629_v28, 2147483647  ;;  %v640_v37 = vsel %vm526_vm1, %v632_v32, 2147483647  ;;  %v643_v38 = vsel %vm526_vm1, %v633_v33, 2147483647  ;;  %v813_v39 = vadd.f32 %v812_v24, %v1560_v17 }
 0x11e   : > { %vm641_vm6 = vcmp.lt.s32.totalorder %v636_v34, %v640_v37  ;;  %vm644_vm7 = vcmp.lt.s32.totalorder %v637_v36, %v643_v38  ;;  %v551_v40 = vsub.f32 %v1560_v17, %v1529_v43  ;;  %vm622_vm9 = vcmp.eq.f32.partialorder %v1535_v49, %v1560_v17 }
 0x11f   : > { %v642_v41 = vsel %vm641_vm6, %v636_v34, %v640_v37  ;;  %v645_v42 = vsel %vm644_vm7, %v637_v36, %v643_v38  ;;  %v552_v44 = vsub.f32 %v1560_v17, %v1533_v46  ;;  %v559_v47 = vmul.f32 %v1575_v23, %v550_v31 }
 0x120   : > { %v814_v48 = vmax.f32 %v813_v39, 0.0  ;;  %vm623_vm10 = vcmp.eq.f32.partialorder %v1529_v43, %v1560_v17  ;;  %v565_v50 = vmul.f32 1.442695, %v557_v35  ;;  %vm652_vm11 = vcmp.lt.s32.totalorder %v642_v41, %v645_v42 }
 0x121   : > { %vm626_vm12 = vcmp.eq.f32.partialorder %v1531_v45, %v1560_v17  ;;  %vm627_vm13 = vcmp.eq.f32.partialorder %v1539_v52, %v1560_v17  ;;  %v630_v49 = vsel %vm622_vm9, %v1582_v25, 64  ;;  %v631_v54 = vsel %vm623_vm10, %v1585_v26, 64 }
 0x122   : > { %v849_v53 = vsel %vm848_vm8, %v814_v48, 0.0  ;;  %v634_v46 = vsel %vm626_vm12, %v1590_v29, 64  ;;  %v635_v55 = vsel %vm627_vm13, %v1593_v30, 64  ;;  %v638_v43 = vsel %vm526_vm1, %v630_v49, 2147483647  ;;  %v692_v48 = vld [vmem:[%s1759_s4 + $0x8] sm:$0xff] }
 0x123   : > { %850 = vadd.xlane.f32.xlu0 %v849_v53  ;;  %v639_v56 = vsel %vm526_vm1, %v631_v54, 2147483647  ;;  %v549_v57 = vsub.f32 %v1560_v17, %v1537_v51  ;;  %v553_v59 = vsub.f32 %v1560_v17, %v1549_v58  ;;  %v554_v60 = vsub.f32 %v1560_v17, %v1531_v45 }
 0x124   : > { %v646_v61 = vsel %vm526_vm1, %v634_v46, 2147483647  ;;  %v649_v62 = vsel %vm526_vm1, %v635_v55, 2147483647  ;;  %v560_v63 = vmul.f32 %v1575_v23, %v551_v40  ;;  %v561_v1 = vmul.f32 %v1575_v23, %v552_v44 }
 0x125   : > { %vm647_vm14 = vcmp.lt.s32.totalorder %v638_v43, %v646_v61  ;;  %vm650_vm15 = vcmp.lt.s32.totalorder %v639_v56, %v649_v62  ;;  %v558_v0 = vmul.f32 %v1575_v23, %v549_v57  ;;  %v653_v51 = vsel %vm652_vm11, %v642_v41, %v645_v42 }
 0x126   : > { %v648_v2 = vsel %vm647_vm14, %v638_v43, %v646_v61  ;;  %v651_v3 = vsel %vm650_vm15, %v639_v56, %v649_v62  ;;  %1236 = vpow2.f32 %v565_v50  ;;  %v569_v58 = vmul.f32 1.442695, %v559_v47 }
 0x127   : > { %vm654_vm0 = vcmp.lt.s32.totalorder %v648_v2, %v651_v3  ;;  %v567_v45 = vmul.f32 1.442695, %v558_v0  ;;  %v555_v4 = vsub.f32 %v1560_v17, %v1539_v52  ;;  %v562_v6 = vmul.f32 %v1575_v23, %v553_v59 }
 0x128   : > { %v655_v5 = vsel %vm654_vm0, %v648_v2, %v651_v3  ;;  %v571_v7 = vmul.f32 1.442695, %v560_v63  ;;  %v563_v9 = vmul.f32 %v1575_v23, %v554_v60  ;;  %v573_v10 = vmul.f32 1.442695, %v561_v1 }
 0x129   : > { %vm656_vm2 = vcmp.lt.s32.totalorder %v653_v51, %v655_v5  ;;  %1238 = vpow2.f32 %v567_v45  ;;  %v564_v12 = vmul.f32 %v1575_v23, %v555_v4  ;;  %v575_v13 = vmul.f32 1.442695, %v562_v6 }
 0x12a   : > { %v657_v8 = vsel %vm656_vm2, %v653_v51, %v655_v5  ;;  %1240 = vpow2.f32 %v569_v58  ;;  %v577_v52 = vmul.f32 1.442695, %v563_v9  ;;  %v1353_v32 = vmov 1.0  }
 0x12b   : > { %v658_v11 = vrot.slane %v657_v8, 4  ;;  %1242 = vpow2.f32 %v571_v7  ;;  %v579_v17 = vmul.f32 1.442695, %v564_v12  ;;  %vm862_vm14 = vcmask 0  }
 0x12c   : > { %1244 = vpow2.f32 %v573_v10  ;;  %vm839_vm15 = vcmask 7168  }
 0x12d   : > { %vm659_vm3 = vcmp.lt.s32.totalorder %v657_v8, %v658_v11  ;;  %1246 = vpow2.f32 %v575_v13 }
 0x12e   : > { %v660_v14 = vsel %vm659_vm3, %v657_v8, %v658_v11  ;;  %1248 = vpow2.f32 %v577_v52 }
 0x12f   : > { %v661_v15 = vrot.slane %v660_v14, 2  ;;  %1250 = vpow2.f32 %v579_v17 }
 0x131   : > { %vm662_vm4 = vcmp.lt.s32.totalorder %v660_v14, %v661_v15 }
 0x132   : > { %v663_v18 = vsel %vm662_vm4, %v660_v14, %v661_v15  ;;  %v860_v14 = vstv %s356_s23  ;;  %s1105_s23 = sshll.u32 %s1341_s27, 9  ;;  %s1269_s27 = scalar_lea.vmem %s1701_s22, 512 }
 0x133   : > { %v664_v22 = vrot.slane %v663_v18, 1  ;;  %v1641_v24 = vpop.eup %1236  ;;  %s1707_s12 = scalar_lea.hbm %s1760_s5, %s1105_s23  ;;  %p1270_p10 = scmp.ne.s32.totalorder %s1701_s22, %s1269_s27 }
 0x134   : > { %v581_v23 = vsel %vm526_vm1, %v1641_v24, 0.0 }
 0x135   : > { %vm665_vm5 = vcmp.lt.s32.totalorder %v663_v18, %v664_v22  ;;  %p1271_p11 = pnand %p1270_p10, %p1437_p4 }
 0x136   : > { %v1239_v27 = vpop.eup %1238  ;;  %v666_v28 = vsel %vm665_vm5, %v663_v18, %v664_v22 }
 0x137   : > { %vm674_vm6 = vcmp.eq.s32.totalorder %v1593_v30, %v666_v28  ;;  %v1241_v31 = vpop.eup %1240  ;;  %vm673_vm7 = vcmp.eq.s32.totalorder %v1590_v29, %v666_v28  ;;  %v582_v33 = vsel %vm526_vm1, %v1239_v27, 0.0  ;;  %vm672_vm8 = vcmp.eq.s32.totalorder %v1569_v21, %v666_v28  ;;  %p1272_p13 = pneg %p1271_p11 }
 0x138   : > { %1136 = vmatprep.subr.msk.mxu1 %vm674_vm6, %v1353_v32  ;;  %v1243_v34 = vpop.eup %1242  ;;  %v583_v35 = vadd.f32 %v582_v33, %v581_v23  ;;  %v584_v36 = vsel %vm526_vm1, %v1241_v31, 0.0  ;;  %vm671_vm9 = vcmp.eq.s32.totalorder %v1566_v20, %v666_v28  ;;  %vm670_vm10 = vcmp.eq.s32.totalorder %v1585_v26, %v666_v28 }
 0x139   : > { %1137 = vmatpush3.msk.msra.mxu1 %vm674_vm6, %v1353_v32  ;;  %v1245_v30 = vpop.eup %1244  ;;  %v586_v38 = vsel %vm526_vm1, %v1243_v34, 0.0  ;;  %vm669_vm11 = vcmp.eq.s32.totalorder %v1582_v25, %v666_v28  ;;  %vm668_vm12 = vcmp.eq.s32.totalorder %v1563_v19, %v666_v28  ;;  %vm667_vm13 = vcmp.eq.s32.totalorder %v1558_v16, %v666_v28  ;;  %v693_v25 = vld [vmem:[%s1759_s4 + $0x10] sm:$0xff]  ;;  %v694_v16 = vld [vmem:[%s1759_s4 + $0x18] sm:$0xff] }
 0x13a   : > { %1138 = vmatprep.subr.msk.mxu1 %vm673_vm7, %v1353_v32  ;;  %v585_v37 = vadd.f32 %v584_v36, %v583_v35  ;;  %v1247_v39 = vpop.eup %1246  ;;  %v588_v40 = vsel %vm526_vm1, %v1245_v30, 0.0 }
 0x13b   : > { %1139 = vmatpush3.msk.msra.mxu1 %vm673_vm7, %v1353_v32  ;;  %v1249_v41 = vpop.eup %1248  ;;  %v590_v42 = vsel %vm526_vm1, %v1247_v39, 0.0 }
 0x13c   : > { %1140 = vmatprep.subr.msk.mxu1 %vm672_vm8, %v1353_v32  ;;  %v587_v29 = vadd.f32 %v586_v38, %v585_v37  ;;  %v1251_v44 = vpop.eup %1250  ;;  %v592_v47 = vsel %vm526_vm1, %v1249_v41, 0.0 }
 0x13d   : > { %1141 = vmatpush3.msk.msra.mxu1 %vm672_vm8, %v1353_v32  ;;  %v594_v50 = vsel %vm526_vm1, %v1251_v44, 0.0 }
 0x13e   : > { %1142 = vmatprep.subr.msk.mxu1 %vm671_vm9, %v1353_v32  ;;  %v589_v21 = vadd.f32 %v588_v40, %v587_v29 }
 0x13f   : > { %1143 = vmatpush3.msk.msra.mxu1 %vm671_vm9, %v1353_v32 }
 0x140   : > { %1144 = vmatprep.subr.msk.mxu1 %vm670_vm10, %v1353_v32  ;;  %v591_v20 = vadd.f32 %v590_v42, %v589_v21 }
 0x141   : > { %1145 = vmatpush3.msk.msra.mxu1 %vm670_vm10, %v1353_v32 }
 0x142   : > { %1146 = vmatprep.subr.msk.mxu1 %vm669_vm11, %v1353_v32  ;;  %v593_v26 = vadd.f32 %v592_v47, %v591_v20 }
 0x143   : > { %1147 = vmatpush3.msk.msra.mxu1 %vm669_vm11, %v1353_v32 }
 0x144   : > { %1148 = vmatprep.subr.msk.mxu1 %vm668_vm12, %v1353_v32  ;;  %v595_v53 = vadd.f32 %v594_v50, %v593_v26 }
 0x145   : > { %1149 = vmatpush3.msk.msra.mxu1 %vm668_vm12, %v1353_v32 }
 0x146   : > { %1150 = vmatprep.subr.msk.mxu1 %vm667_vm13, %v1353_v32  ;;  %v596_v19 = vrot.slane %v595_v53, 4 }
 0x147   : > { %1151 = vmatpush3.msk.msra.mxu1 %vm667_vm13, %v1353_v32 }
 0x148   : > { %1153 = vmatmul.mubr.msk.f32.vlgmr.msra.gmra.mxu1 %vm526_vm1, %v692_v48  ;;  %v597_v49 = vadd.f32 %v596_v19, %v595_v53 }
 0x149   : > { %1155 = vmatprep.mubr.msk.f32.mxu1 %vm526_vm1, %v693_v25 }
 0x14a   : > { %v598_v54 = vrot.slane %v597_v49, 2 }
 0x14c   : > { %1156 = vmatmul.mubr.msk.f32.gmra.mxu1 %vm526_vm1, %v694_v16  ;;  %v599_v46 = vadd.f32 %v598_v54, %v597_v49 }
 0x14e   : > { %v600_v55 = vrot.slane %v599_v46, 1 }
 0x150   : > { %v601_v43 = vadd.f32 %v600_v55, %v599_v46 }
 0x152   : > { %1252 = vrcp.f32 %v601_v43 }
 0x15f   : > { %v1253_v56 = vpop.eup %1252 }
 0x160   : > { %v604_v57 = vmul.f32 %v1253_v56, %v1239_v27  ;;  %v603_v59 = vmul.f32 %v1253_v56, %v1641_v24  ;;  %v605_v62 = vmul.f32 %v1253_v56, %v1241_v31  ;;  %v606_v63 = vmul.f32 %v1253_v56, %v1243_v34 }
 0x161   : > { %v607_v51 = vmul.f32 %v1253_v56, %v1245_v30  ;;  %v608_v2 = vmul.f32 %v1253_v56, %v1247_v39  ;;  %v609_v45 = vmul.f32 %v1253_v56, %v1249_v41  ;;  %v610_v4 = vmul.f32 %v1253_v56, %v1251_v44 }
 0x162   : > { %v818_v60 = vsel %vm526_vm1, %v604_v57, 0.0  ;;  %v815_v61 = vsel %vm526_vm1, %v603_v59, 0.0  ;;  %v821_v0 = vsel %vm526_vm1, %v605_v62, 0.0  ;;  %v824_v1 = vsel %vm526_vm1, %v606_v63, 0.0 }
 0x163   : > { %819 = vadd.xlane.f32.xlu0 %v818_v60  ;;  %816 = vadd.xlane.f32.xlu1 %v815_v61  ;;  %v827_v3 = vsel %vm526_vm1, %v607_v51, 0.0  ;;  %v830_v58 = vsel %vm526_vm1, %v608_v2, 0.0  ;;  %v833_v5 = vsel %vm526_vm1, %v609_v45, 0.0  ;;  %v836_v6 = vsel %vm526_vm1, %v610_v4, 0.0 }
 0x167   : > { %822 = vadd.xlane.f32.xlu0 %v821_v0  ;;  %825 = vadd.xlane.f32.xlu1 %v824_v1 }
 0x16b   : > { %828 = vadd.xlane.f32.xlu0 %v827_v3  ;;  %831 = vadd.xlane.f32.xlu1 %v830_v58 }
 0x16f   : > { %834 = vadd.xlane.f32.xlu0 %v833_v5  ;;  %837 = vadd.xlane.f32.xlu1 %v836_v6 }
 0x1ac   : > { %v851_v7 = vpop.xlane.xlu0 %850 }
 0x1ad   : > { %v852_v8 = vrot.slane %v851_v7, 4 }
 0x1af   : > { %v853_v9 = vadd.f32 %v852_v8, %v851_v7 }
 0x1b1   : > { %v854_v10 = vrot.slane %v853_v9, 2 }
 0x1b3   : > { %v855_v11 = vadd.f32 %v854_v10, %v853_v9 }
 0x1b5   : > { %v856_v12 = vrot.slane %v855_v11, 1 }
 0x1b7   : > { %v857_v13 = vadd.f32 %v856_v12, %v855_v11 }
 0x1b9   : > { %1158 = vpush %v857_v13 }
 0x1ea   : > { %s1159_s10 = spop %1158 }
 0x1eb   : > { %v859_v52 = vstv %s1159_s10 }
 0x1ec   : > { %v861_v15 = vmul.f32 %v860_v14, %v859_v52  ;;  %v820_v17 = vpop.xlane.xlu0 %819  ;;  %v817_v18 = vpop.xlane.xlu1 %816 }
 0x1ed   : > { %841 = vst.msk [vmem:[%s348_s19 + $0x8] sm:$0xff] %vm839_vm15, %v820_v17  ;;  %840 = vst.msk [vmem:[%s348_s19] sm:$0xff] %vm839_vm15, %v817_v18 }
 0x1ee   : > { %863 = vst.msk [vmem:[%s354_s16] sm:$0x1] %vm862_vm14, %v861_v15  ;;  %s1354_s16 = smov [#allocation5]  }
 0x1ef   : > { %s1273_s17 = sshll.u32 %s1354_s16, 4  ;;  %s1274_s17 = int_to_ptr.vmem [resolvable:$false] %s1273_s17 }
 0x1f0   : > { %v823_v22 = vpop.xlane.xlu0 %822  ;;  %v826_v24 = vpop.xlane.xlu1 %825  ;;  %s1275_s18 = scalar_lea.vmem %s1274_s17, 1024  ;;  %p1276_p0 = scmp.lt.s32.totalorder %s1701_s22, %s1274_s17 }
 0x1f1   : > { %842 = vst.msk [vmem:[%s348_s19 + $0x10] sm:$0xff] %vm839_vm15, %v823_v22  ;;  %843 = vst.msk [vmem:[%s348_s19 + $0x18] sm:$0xff] %vm839_vm15, %v826_v24  ;;  %p1277_p1 = scmp.lt.s32.totalorder %s1275_s18, %s1269_s27 }
 0x1f3   : > { %p1278_p2 = por %p1277_p1, %p1276_p0 }
 0x1f4   : > { %v829_v27 = vpop.xlane.xlu0 %828  ;;  %v832_v28 = vpop.xlane.xlu1 %831 }
 0x1f5   : > { %844 = vst.msk [vmem:[%s348_s19 + $0x20] sm:$0xff] %vm839_vm15, %v829_v27  ;;  %845 = vst.msk [vmem:[%s348_s19 + $0x28] sm:$0xff] %vm839_vm15, %v832_v28  ;;  %p1279_p3 = pnand %p1278_p2, %p1272_p13 }
 0x1f8   : > { %v835_v23 = vpop.xlane.xlu0 %834  ;;  %v838_v31 = vpop.xlane.xlu1 %837 }
 0x1f9   : > { %846 = vst.msk [vmem:[%s348_s19 + $0x30] sm:$0xff] %vm839_vm15, %v835_v23  ;;  %847 = vst.msk [vmem:[%s348_s19 + $0x38] sm:$0xff] %vm839_vm15, %v838_v31 }
 0x208   : > { %v1154_v32 = vpop.f32.mrf.mxu1 }
 0x209   : > { %793 = vst.msk [vmem:[%s312_s21 + $0x8] sm:$0xff] %vm526_vm1, %v1154_v32 }
 0x20a   : > { %v773_v33 = vpop.f32.mrf.mxu1 }
 0x20b   : > { %792 = vst.msk [vmem:[%s312_s21] sm:$0xff] %vm526_vm1, %v773_v33 }
 0x20c   : > { %v1157_v34 = vpop.f32.mrf.mxu1 }
 0x20d   : > { %795 = vst.msk [vmem:[%s312_s21 + $0x18] sm:$0xff] %vm526_vm1, %v1157_v34 }
 0x20e   : > { %v783_v35 = vpop.f32.mrf.mxu1 }
 0x20f   : > { %794 = vst.msk [vmem:[%s312_s21 + $0x10] sm:$0xff] %vm526_vm1, %v783_v35 }
 0x210   : > { %1282 = shalt.err (!%p1279_p3)
}
 0x211   : > { %s1283_s19 = scalar_lea.hbm %s1707_s12, 512  ;;  %s1287_s21 = scalar_lea.hbm %s1760_s5, 1024 }
 0x212   : > { %p1284_p5 = scmp.ne.s32.totalorder %s1707_s12, %s1283_s19  ;;  %p1288_p9 = scmp.lt.s32.totalorder %s1707_s12, %s1760_s5 }
 0x213   : > { %p1289_p12 = scmp.lt.s32.totalorder %s1287_s21, %s1283_s19 }
 0x214   : > { %p1285_p6 = pnand %p1284_p5, %p1437_p4 }
 0x215   : > { %p1290_p10 = por %p1289_p12, %p1288_p9 }
 0x216   : > { %p1286_p7 = pneg %p1285_p6 }
 0x218   : > { %p1291_p11 = pnand %p1290_p10, %p1286_p7 }
 0x21a   : > { %1294 = shalt.err (!%p1291_p11)
}
 0x21b   : > { %s1355_s10 = smov 128   ;;  %s1356_s27 = smov 8  }
 0x21c   : > { %1164 = dma.vmem_to_hbm [thread:$0]  (%p1437_p4), %s1701_s22, 512, %s1707_s12, %s1710_s15, %s1355_s10, %s1355_s10, %s1356_s27  }
 0x21d PF: > { %p1176_p13 = scmp.ge.s32.totalorder %s1349_s29, 2  ;;  %s915_s16 = sand.u32 1, %s1329_s24  }
 0x21e   : > { %s916_s17 = scalar_lea.sflag [#allocation3], %s915_s16 }
 0x21f   : > { %p1171_p0 = pnand %p1176_p13, %p1444_p8 }
 0x221   : > { %p1172_p1 = pneg %p1171_p0 }
 0x223   : > { %1324 = dma.done.wait (%p1172_p1), %s916_s17, 512  }
 0x224   : > { %1326 = vsyncadd (%p1172_p1), %s916_s17, 4294966784  ;;  %s22_s29 = sadd.s32 1, %s1349_s29   ;;  %s1767_s24 = smov %s1333_s25 }
 0x225   : > { %p19_p2 = scmp.ge.s32.totalorder %s22_s29, 4   ;;  %s1768_s25 = smov %s1337_s26 }
 0x226   : > { %s1769_s26 = smov %s1450_s14  ;;  %s1770_s27 = smov %s1345_s28 }
 0x227   : > { %s1771_s28 = smov %s1773_s9  ;;  %21 = sbr.rel (!%p19_p2) target bundleno = 5 (0x5), region = 104 }
 0x22c   :  { %942 = vsyncpa [#allocation3], 1 }
 0x22d   :  { %944 = vsyncpa [#allocation3 + $0x1], 1 }
 0x22e   :  { %945 = vsyncpa [#allocation4], 1 }
 0x22f   :  { %947 = vsyncpa [#allocation4 + $0x1], 1 }

</bundles_post_ra>
